<compile_context>
chip_gen: v5e
topology: v5e:2x2
jax: 0.10.0
libtpu: 0.0.40
codegen_flags: <defaults>
</compile_context>

<pallas_src>
from typing import List, Optional, Tuple

import jax
import jax.numpy as jnp
from jax.experimental import pallas as pl
from jax.experimental.pallas import tpu as pltpu

LANE = 128


def _round_up(x: int, m: int) -> int:
    return ((x + m - 1) // m) * m


# ---------------------------------------------------------------------------
# Shared math (used by the Pallas kernels AND the small-batch XLA fallback)
# ---------------------------------------------------------------------------

def _feature_math(x, w1, w2, b):
    cd = w1.dtype
    hp1, hp2 = w1.shape[1], w2.shape[1]
    h = jnp.dot(x.astype(cd), w1, preferred_element_type=jnp.float32)
    h = jnp.maximum(h + b[0:1, :hp1], 0.0)
    h = jnp.dot(h.astype(cd), w2, preferred_element_type=jnp.float32)
    h = jnp.maximum(h + b[1:2, :hp2], 0.0)
    return h  # f32, lane-dense width hp2


def _qnet_math(x, w1, w2, wo, b):
    out_w = wo.shape[1]
    h = _feature_math(x, w1, w2, b)
    q = jnp.dot(h, wo, preferred_element_type=jnp.float32)   # wo kept f32
    return q + b[2:3, :out_w]


def _qnet_dueling_math(x, w1, w2, wh1, wh2, b):
    cd = w1.dtype
    hhp = wh1.shape[1]
    out_w = wh2.shape[1]
    h = _feature_math(x, w1, w2, b)
    s = jnp.dot(h.astype(cd), wh1, preferred_element_type=jnp.float32)
    s = jnp.maximum(s + b[2:3, :hhp], 0.0)
    # Final (folded-combine) matmul stays f32 for exact dueling numerics.
    q = jnp.dot(s, wh2, preferred_element_type=jnp.float32)
    return q + b[3:4, :out_w]


# ---------------------------------------------------------------------------
# Pallas kernels (one narrow, per-tile store each; all heads fused)
# ---------------------------------------------------------------------------

def _qnet_kernel(x_ref, w1_ref, w2_ref, wo_ref, b_ref, q_ref):
    q_ref[...] = _qnet_math(x_ref[...], w1_ref[...], w2_ref[...],
                            wo_ref[...], b_ref[...])


def _qnet_dueling_kernel(x_ref, w1_ref, w2_ref, wh1_ref, wh2_ref, b_ref, q_ref):
    q_ref[...] = _qnet_dueling_math(x_ref[...], w1_ref[...], w2_ref[...],
                                    wh1_ref[...], wh2_ref[...], b_ref[...])


# ---------------------------------------------------------------------------
# Parameter construction (mimics nn.Linear's U(-1/sqrt(in), 1/sqrt(in)))
# ---------------------------------------------------------------------------

def _linear_params(key, in_dim, out_dim):
    kw, kb = jax.random.split(key)
    bound = 1.0 / jnp.sqrt(jnp.float32(in_dim))
    w = jax.random.uniform(kw, (in_dim, out_dim), jnp.float32, -bound, bound)
    b = jax.random.uniform(kb, (1, out_dim), jnp.float32, -bound, bound)
    return w, b


def init_qnetwork_params(key, state_size: int, action_dims: List[int],
                         hidden_layers: List[int], dueling: bool):
    assert len(hidden_layers) == 2, "kernel is specialized for 2 hidden layers"
    h1, h2 = hidden_layers
    keys = jax.random.split(key, 16 + 2 * len(action_dims))
    ki = iter(keys)
    params = {}
    params["w1"], params["b1"] = _linear_params(next(ki), state_size, h1)
    params["w2"], params["b2"] = _linear_params(next(ki), h1, h2)
    if dueling:
        half = h2 // 2
        params["wv1"], params["bv1"] = _linear_params(next(ki), h2, half)
        params["wv2"], params["bv2"] = _linear_params(next(ki), half, 1)
        params["adv"] = []
        for a in action_dims:
            wa1, ba1 = _linear_params(next(ki), h2, half)
            wa2, ba2 = _linear_params(next(ki), half, a)
            params["adv"].append((wa1, ba1, wa2, ba2))
    else:
        wos, bos = [], []
        for a in action_dims:
            wo, bo = _linear_params(next(ki), h2, a)
            wos.append(wo)
            bos.append(bo)
        params["wo"] = jnp.concatenate(wos, axis=1)
        params["bo"] = jnp.concatenate(bos, axis=1)
    return params


# ---------------------------------------------------------------------------
# Operand packing: fuse heads, pad hidden widths to 128 lanes, fold dueling
# combine into the stage-2 weights, optionally pre-cast operands to bf16.
# ---------------------------------------------------------------------------

def pack_qnetwork_params(params, state_size: int, action_dims: List[int],
                         hidden_layers: List[int], dueling: bool,
                         *, compute_dtype=jnp.float32):
    h1, h2 = hidden_layers
    total_actions = sum(action_dims)
    hp1 = _round_up(h1, LANE)
    hp2 = _round_up(h2, LANE)
    cd = compute_dtype

    # Lane-padded feature layers; padded columns/rows are zero so padded hidden
    # lanes are relu(0 + 0) = 0 and contribute nothing downstream.
    w1 = jnp.zeros((state_size, hp1), jnp.float32).at[:, :h1].set(params["w1"]).astype(cd)
    w2 = jnp.zeros((hp1, hp2), jnp.float32).at[:h1, :h2].set(params["w2"]).astype(cd)

    if not dueling:
        out_w = total_actions
        bw = max(hp1, hp2)
        wo = jnp.zeros((hp2, out_w), jnp.float32).at[:h2, :].set(params["wo"])  # f32
        b = jnp.zeros((3, bw), jnp.float32)
        b = b.at[0, :h1].set(params["b1"][0])
        b = b.at[1, :h2].set(params["b2"][0])
        b = b.at[2, :out_w].set(params["bo"][0])
        return dict(dueling=False, w1=w1, w2=w2, wo=wo, b=b,
                    hp1=hp1, hp2=hp2, hhp=0, out_w=out_w)

    n_heads = len(action_dims)
    half = h2 // 2
    hh = (n_heads + 1) * half          # fused stage-1 width: value + all adv hiddens
    hhp = _round_up(hh, LANE)
    out_w = 1 + total_actions          # layout: [value | q_head0 | q_head1 | ...]
    bw = max(hp1, hp2, hhp)

    # Fused stage-1: [wv1 | wa1_0 | wa1_1 | ...], lane-padded.
    wh1_raw = jnp.concatenate([params["wv1"]] + [a[0] for a in params["adv"]], axis=1)
    bh1_raw = jnp.concatenate([params["bv1"]] + [a[1] for a in params["adv"]], axis=1)[0]
    wh1 = jnp.zeros((hp2, hhp), jnp.float32).at[:h2, :hh].set(wh1_raw).astype(cd)

    # Fused block-diagonal stage-2 producing [value | adv_0 | adv_1 | ...].
    wh2 = jnp.zeros((hhp, out_w), jnp.float32).at[:half, 0:1].set(params["wv2"])
    bh2 = jnp.zeros((out_w,), jnp.float32).at[0].set(params["bv2"][0, 0])
    col = 1
    for i, a in enumerate(action_dims):
        r0 = (i + 1) * half
        wh2 = wh2.at[r0:r0 + half, col:col + a].set(params["adv"][i][2])
        bh2 = bh2.at[col:col + a].set(params["adv"][i][3][0])
        col += a

    # Fold the (linear, exact) dueling combine q = v + adv - mean(adv) into the
    # stage-2 weights:  q_row = raw_row @ (I + D), with, per head h (TRUE width
    # a_h):  D[0, cols_h] = 1  and  D[cols_h, cols_h] = -1/a_h.  Column 0 of D
    # is zero so the value column passes through untouched, and padded lanes
    # never enter any mean.  Kept in f32 (precision-critical, tiny).
    D = jnp.zeros((out_w, out_w), jnp.float32)
    col = 1
    for a in action_dims:
        D = D.at[0, col:col + a].set(1.0)
        D = D.at[col:col + a, col:col + a].set(-1.0 / a)
        col += a
    T = jnp.eye(out_w, dtype=jnp.float32) + D
    wh2 = wh2 @ T
    bh2 = bh2 @ T

    b = jnp.zeros((4, bw), jnp.float32)
    b = b.at[0, :h1].set(params["b1"][0])
    b = b.at[1, :h2].set(params["b2"][0])
    b = b.at[2, :hh].set(bh1_raw)
    b = b.at[3, :out_w].set(bh2)
    return dict(dueling=True, w1=w1, w2=w2, wh1=wh1, wh2=wh2, b=b,
                hp1=hp1, hp2=hp2, hhp=hhp, out_w=out_w)


# ---------------------------------------------------------------------------
# Wrapper: batch-tiled grid, pinned weights, narrow output, small-batch bypass
# ---------------------------------------------------------------------------

def qnetwork_forward(state, packed, action_dims: List[int], dueling: bool,
                     *, batch_tile: int = 4096, min_pallas_batch: int = 256
                     ) -> Tuple[List[jnp.ndarray], Optional[jnp.ndarray]]:
    assert packed["dueling"] == dueling
    B, S = state.shape
    out_w = packed["out_w"]

    if dueling:
        operands = (packed["w1"], packed["w2"], packed["wh1"], packed["wh2"], packed["b"])
        math_fn, kernel = _qnet_dueling_math, _qnet_dueling_kernel
    else:
        operands = (packed["w1"], packed["w2"], packed["wo"], packed["b"])
        math_fn, kernel = _qnet_math, _qnet_kernel

    if B < min_pallas_batch:
        # Tiny batches: a pallas_call is pure fixed overhead; run the identical
        # packed-operand math as plain XLA.
        slab = math_fn(state, *operands)
    else:
        B8 = _round_up(B, 8)
        TB = min(_round_up(batch_tile, 8), B8)
        if B8 >= 16:
            # >= 2 grid steps so the "parallel" axis can shard across both v7x
            # TensorCores (no-op on single-TC v5e/v6e).
            TB = min(TB, _round_up(pl.cdiv(B8, 2), 8))
        # VMEM guard (double-buffered in/out + f32 intermediates); keeps the
        # working set well under the 32 MiB scoped default on every generation
        # (v7x only has 64 MiB physical VMEM).
        per_row = (2 * S * state.dtype.itemsize + 2 * out_w * 4
                   + 4 * (packed["hp1"] + packed["hp2"] + packed["hhp"] + out_w))
        TB = max(8, min(TB, ((24 << 20) // per_row) // 8 * 8))

        B_pad = _round_up(B, TB)
        if B_pad != B:
            state = jnp.zeros((B_pad, S), state.dtype).at[:B].set(state)
        grid = (B_pad // TB,)

        def pinned(arr):  # full-array block, constant index_map -> VMEM-resident
            return pl.BlockSpec(arr.shape, lambda i: (0, 0))

        slab = pl.pallas_call(
            kernel,
            out_shape=jax.ShapeDtypeStruct((B_pad, out_w), jnp.float32),
            grid=grid,
            in_specs=[pl.BlockSpec((TB, S), lambda i: (i, 0))]
                     + [pinned(a) for a in operands],
            out_specs=pl.BlockSpec((TB, out_w), lambda i: (i, 0)),
            compiler_params=pltpu.CompilerParams(
                dimension_semantics=("parallel",)),
        )(state, *operands)

    # Glue: slice the narrow slab into per-head Q tensors (+ value).  Consumers
    # that can take static column offsets should use `slab` directly (or jit
    # this wrapper together with the consumer) to avoid re-reading it from HBM.
    q_values, off = [], (1 if dueling else 0)
    for a in action_dims:
        q_values.append(slab[:B, off:off + a])
        off += a
    value = slab[:B, 0:1] if dueling else None
    return q_values, value


# ---------------------------------------------------------------------------
# Pure-JAX reference (uses the raw, unpacked params)
# ---------------------------------------------------------------------------

def qnetwork_reference(state, params, action_dims, dueling):
    h = jnp.maximum(state @ params["w1"] + params["b1"], 0.0)
    h = jnp.maximum(h @ params["w2"] + params["b2"], 0.0)
    if not dueling:
        q_cat = h @ params["wo"] + params["bo"]
        out, off = [], 0
        for a in action_dims:
            out.append(q_cat[:, off:off + a])
            off += a
        return out, None
    vh = jnp.maximum(h @ params["wv1"] + params["bv1"], 0.0)
    value = vh @ params["wv2"] + params["bv2"]
    q_values = []
    for (wa1, ba1, wa2, ba2) in params["adv"]:
        ah = jnp.maximum(h @ wa1 + ba1, 0.0)
        adv = ah @ wa2 + ba2
        q_values.append(value + (adv - jnp.mean(adv, axis=1, keepdims=True)))
    return q_values, value


# ---------------------------------------------------------------------------
# Main
# ---------------------------------------------------------------------------

if __name__ == "__main__":
    key = jax.random.PRNGKey(0)
    k_state, k_big, k_p1, k_p2 = jax.random.split(key, 4)

    batch = 2
    state_size = 16
    hidden_layers = [32, 32]
    action_dims = [4, 3]

    state = jax.random.normal(k_state, (batch, state_size), dtype=jnp.float32)

    # --- non-dueling path (f32), kernel forced on ---
    params = init_qnetwork_params(k_p1, state_size, action_dims, hidden_layers,
                                  dueling=False)
    packed = pack_qnetwork_params(params, state_size, action_dims, hidden_layers,
                                  dueling=False)
    q_vals, v = qnetwork_forward(state, packed, action_dims, dueling=False,
                                 min_pallas_batch=1)
    jax.block_until_ready(q_vals)
    q_ref, _ = qnetwork_reference(state, params, action_dims, dueling=False)
    for a, b in zip(q_vals, q_ref):
        assert jnp.allclose(a, b, atol=1e-4, rtol=1e-4)
    assert v is None

    # --- dueling path (f32), kernel forced on ---
    params_d = init_qnetwork_params(k_p2, state_size, action_dims, hidden_layers,
                                    dueling=True)
    packed_d = pack_qnetwork_params(params_d, state_size, action_dims, hidden_layers,
                                    dueling=True)
    q_d, v_d = qnetwork_forward(state, packed_d, action_dims, dueling=True,
                                min_pallas_batch=1)
    jax.block_until_ready((q_d, v_d))
    q_ref_d, v_ref_d = qnetwork_reference(state, params_d, action_dims, dueling=True)
    for a, b in zip(q_d, q_ref_d):
        assert jnp.allclose(a, b, atol=1e-4, rtol=1e-4)
    assert jnp.allclose(v_d, v_ref_d, atol=1e-4, rtol=1e-4)

    # --- multi-tile batch grid (>= 2 steps; exercises streaming / TC sharding) ---
    big_state = jax.random.normal(k_big, (40, state_size), dtype=jnp.float32)
    q_big, v_big = qnetwork_forward(big_state, packed_d, action_dims, dueling=True,
                                    batch_tile=16, min_pallas_batch=1)
    jax.block_until_ready((q_big, v_big))
    q_ref_big, v_ref_big = qnetwork_reference(big_state, params_d, action_dims,
                                              dueling=True)
    for a, b in zip(q_big, q_ref_big):
        assert jnp.allclose(a, b, atol=1e-4, rtol=1e-4)
    assert jnp.allclose(v_big, v_ref_big, atol=1e-4, rtol=1e-4)

    # --- bf16-operand path (pre-cast weights; f32 accumulation; f32 final layer) ---
    packed_b16 = pack_qnetwork_params(params_d, state_size, action_dims,
                                      hidden_layers, dueling=True,
                                      compute_dtype=jnp.bfloat16)
    q_b16, v_b16 = qnetwork_forward(state, packed_b16, action_dims, dueling=True,
                                    min_pallas_batch=1)
    jax.block_until_ready((q_b16, v_b16))
    for a, b in zip(q_b16, q_ref_d):
        assert jnp.allclose(a, b, atol=1e-1, rtol=1e-1)

    # --- small-batch fallback (plain-XLA path with the same packed operands) ---
    q_fb, v_fb = qnetwork_forward(state, packed_d, action_dims, dueling=True)
    jax.block_until_ready((q_fb, v_fb))
    for a, b in zip(q_fb, q_ref_d):
        assert jnp.allclose(a, b, atol=1e-4, rtol=1e-4)
    assert jnp.allclose(v_fb, v_ref_d, atol=1e-4, rtol=1e-4)

    print("KERNEL_OK")
</pallas_src>

<mosaic_0001>
module attributes {stable_mosaic.version = 11 : i64} {
  func.func @_qnet_kernel(%arg0: i32, %arg1: memref<8x16xf32, #tpu.memory_space<vmem>>, %arg2: memref<16x128xf32, #tpu.memory_space<vmem>>, %arg3: memref<128x128xf32, #tpu.memory_space<vmem>>, %arg4: memref<128x7xf32, #tpu.memory_space<vmem>>, %arg5: memref<3x128xf32, #tpu.memory_space<vmem>>, %arg6: memref<8x7xf32, #tpu.memory_space<vmem>>) attributes {dimension_semantics = [#tpu.dimension_semantics<parallel>], iteration_bounds = array<i64: 1>, scalar_prefetch = 0 : i64, scratch_operands = 0 : i64, tpu.core_type = #tpu.core_type<tc>, window_params = [{transform_indices = @transform_0, window_bounds = array<i64: 8, 16>}, {pipeline_mode = #tpu.pipeline_mode<synchronous>, transform_indices = @transform_1, window_bounds = array<i64: 16, 128>}, {pipeline_mode = #tpu.pipeline_mode<synchronous>, transform_indices = @transform_2, window_bounds = array<i64: 128, 128>}, {pipeline_mode = #tpu.pipeline_mode<synchronous>, transform_indices = @transform_3, window_bounds = array<i64: 128, 7>}, {pipeline_mode = #tpu.pipeline_mode<synchronous>, transform_indices = @transform_4, window_bounds = array<i64: 3, 128>}, {transform_indices = @transform_5, window_bounds = array<i64: 8, 7>}]} {
    %c0 = arith.constant 0 : index
    %c0_0 = arith.constant 0 : index
    %0 = vector.load %arg1[%c0, %c0_0] : memref<8x16xf32, #tpu.memory_space<vmem>>, vector<8x16xf32>
    %c0_1 = arith.constant 0 : index
    %c0_2 = arith.constant 0 : index
    %1 = vector.load %arg2[%c0_1, %c0_2] : memref<16x128xf32, #tpu.memory_space<vmem>>, vector<16x128xf32>
    %c0_3 = arith.constant 0 : index
    %c0_4 = arith.constant 0 : index
    %2 = vector.load %arg3[%c0_3, %c0_4] : memref<128x128xf32, #tpu.memory_space<vmem>>, vector<128x128xf32>
    %c0_5 = arith.constant 0 : index
    %c0_6 = arith.constant 0 : index
    %3 = vector.load %arg4[%c0_5, %c0_6] : memref<128x7xf32, #tpu.memory_space<vmem>>, vector<128x7xf32>
    %c0_7 = arith.constant 0 : index
    %c0_8 = arith.constant 0 : index
    %4 = vector.load %arg5[%c0_7, %c0_8] : memref<3x128xf32, #tpu.memory_space<vmem>>, vector<3x128xf32>
    %cst = arith.constant dense<0.000000e+00> : vector<8x128xf32>
    %5 = tpu.matmul %0, %1, %cst {dimension_numbers = #tpu.dot_dimension_numbers<[1], [0], [0], [1], [0, 0, 1, 1], [], []>} : vector<8x16xf32>, vector<16x128xf32>, vector<8x128xf32> -> vector<8x128xf32>
    %6 = vector.extract_strided_slice %4 {offsets = [0, 0], sizes = [1, 128], strides = [1, 1]} : vector<3x128xf32> to vector<1x128xf32>
    %7 = vector.broadcast %6 : vector<1x128xf32> to vector<8x128xf32>
    %8 = arith.addf %5, %7 : vector<8x128xf32>
    %cst_9 = arith.constant 0.000000e+00 : f32
    %9 = vector.broadcast %cst_9 : f32 to vector<8x128xf32>
    %10 = arith.maximumf %8, %9 : vector<8x128xf32>
    %cst_10 = arith.constant dense<0.000000e+00> : vector<8x128xf32>
    %11 = tpu.matmul %10, %2, %cst_10 {dimension_numbers = #tpu.dot_dimension_numbers<[1], [0], [0], [1], [0, 0, 1, 1], [], []>} : vector<8x128xf32>, vector<128x128xf32>, vector<8x128xf32> -> vector<8x128xf32>
    %12 = vector.extract_strided_slice %4 {offsets = [1, 0], sizes = [1, 128], strides = [1, 1]} : vector<3x128xf32> to vector<1x128xf32>
    %13 = vector.broadcast %12 : vector<1x128xf32> to vector<8x128xf32>
    %14 = arith.addf %11, %13 : vector<8x128xf32>
    %cst_11 = arith.constant 0.000000e+00 : f32
    %15 = vector.broadcast %cst_11 : f32 to vector<8x128xf32>
    %16 = arith.maximumf %14, %15 : vector<8x128xf32>
    %cst_12 = arith.constant dense<0.000000e+00> : vector<8x7xf32>
    %17 = tpu.matmul %16, %3, %cst_12 {dimension_numbers = #tpu.dot_dimension_numbers<[1], [0], [0], [1], [0, 0, 1, 1], [], []>} : vector<8x128xf32>, vector<128x7xf32>, vector<8x7xf32> -> vector<8x7xf32>
    %18 = vector.extract_strided_slice %4 {offsets = [2, 0], sizes = [1, 7], strides = [1, 1]} : vector<3x128xf32> to vector<1x7xf32>
    %19 = vector.broadcast %18 : vector<1x7xf32> to vector<8x7xf32>
    %20 = arith.addf %17, %19 : vector<8x7xf32>
    %c0_13 = arith.constant 0 : index
    %c0_14 = arith.constant 0 : index
    %21 = vector.load %arg6[%c0_13, %c0_14] : memref<8x7xf32, #tpu.memory_space<vmem>>, vector<8x7xf32>
    tpu.vector_store %arg6[%c0_13, %c0_14], %20 {strides = array<i32>} : memref<8x7xf32, #tpu.memory_space<vmem>>, vector<8x7xf32>,
    return
  }
  func.func @transform_0(%arg0: i32) -> (i32, i32) {
    %c0_i32 = arith.constant 0 : i32
    %c0_i32_0 = arith.constant 0 : i32
    return %arg0, %c0_i32 : i32, i32
  }
  func.func @transform_1(%arg0: i32) -> (i32, i32) {
    %c0_i32 = arith.constant 0 : i32
    %c0_i32_0 = arith.constant 0 : i32
    %c0_i32_1 = arith.constant 0 : i32
    return %c0_i32, %c0_i32_0 : i32, i32
  }
  func.func @transform_2(%arg0: i32) -> (i32, i32) {
    %c0_i32 = arith.constant 0 : i32
    %c0_i32_0 = arith.constant 0 : i32
    %c0_i32_1 = arith.constant 0 : i32
    return %c0_i32, %c0_i32_0 : i32, i32
  }
  func.func @transform_3(%arg0: i32) -> (i32, i32) {
    %c0_i32 = arith.constant 0 : i32
    %c0_i32_0 = arith.constant 0 : i32
    %c0_i32_1 = arith.constant 0 : i32
    return %c0_i32, %c0_i32_0 : i32, i32
  }
  func.func @transform_4(%arg0: i32) -> (i32, i32) {
    %c0_i32 = arith.constant 0 : i32
    %c0_i32_0 = arith.constant 0 : i32
    %c0_i32_1 = arith.constant 0 : i32
    return %c0_i32, %c0_i32_0 : i32, i32
  }
  func.func @transform_5(%arg0: i32) -> (i32, i32) {
    %c0_i32 = arith.constant 0 : i32
    %c0_i32_0 = arith.constant 0 : i32
    return %arg0, %c0_i32 : i32, i32
  }
}

</mosaic_0001>

<bundles_post_ra>
// kernel: tpu_custom_call.1
= control target key start
LH: loop header
LB: loop body
LE: loop exit
PB: predicated region body
PF: predicated region fallthrough
CT: control target
= control target key end

     0   :  { %10 = vsyncpa [#allocation3], 0  ;;  %s403_s0 = inlined_call_operand.vmem [shape: f32[8,16], index: 0, kind: input, shape index: {}]   ;;  %s404_s1 = inlined_call_operand.hbm [shape: f32[16,128], index: 1, kind: input, shape index: {}]   ;;  %s405_s2 = inlined_call_operand.vmem [shape: f32[128,128], index: 2, kind: input, shape index: {}]   ;;  %s406_s3 = inlined_call_operand.vmem [shape: f32[128,7], index: 3, kind: input, shape index: {}]   ;;  %s407_s4 = inlined_call_operand.hbm [shape: f32[3,128], index: 4, kind: input, shape index: {}]   ;;  %s408_s5 = inlined_call_operand.hbm [shape: f32[8,7], index: 5, kind: output, shape index: {}]  }
   0x1   :  { %11 = vsyncpa [#allocation6], 0 }
   0x2   :  { %12 = vsyncpa [#allocation4], 0  ;;  %s19_s20 = sshll.u32 %s404_s1, 4  ;;  %s260_s21 = smov [#allocation2]   ;;  %s20_s20 = int_to_ptr.hbm [resolvable:$true] %s19_s20 }
   0x3   :  { %s21_s22 = sshll.u32 %s260_s21, 4  ;;  %s37_s25 = sshll.u32 %s407_s4, 4  ;;  %s22_s22 = int_to_ptr.vmem [resolvable:$true] %s21_s22  ;;  %s38_s25 = int_to_ptr.hbm [resolvable:$true] %s37_s25 }
   0x4   :  { %s261_s26 = smov 128   ;;  %s262_s27 = smov 8  }
   0x5   :  { %27 = dma.hbm_to_vmem [thread:$0]  %s20_s20, 256, %s22_s22, [#allocation3], %s261_s26, %s261_s26, %s262_s27  }
   0x6   :  { %s263_s28 = smov [#allocation5]  }
   0x7   :  { %s39_s29 = sshll.u32 %s263_s28, 4  ;;  %s40_s29 = int_to_ptr.vmem [resolvable:$true] %s39_s29 }
   0x8   :  { %42 = dma.hbm_to_vmem [thread:$0]  %s38_s25, 64, %s40_s29, [#allocation6]  }
   0x9   :  { %254 = dma.done.wait [#allocation3], 256  }
   0xa   :  { %255 = vsyncadd [#allocation3], 4294967040 }
   0xb   :  { %256 = dma.done.wait [#allocation6], 64  }
   0xc   :  { %257 = vsyncadd [#allocation6], 4294967232  ;;  %v53_v0 = vld [vmem:[#allocation2 + $0x8] sm:$0xff]  ;;  %v52_v1 = vld [vmem:[#allocation2] sm:$0xff]  ;;  %vm88_vm0 = vcmask 130048   ;;  %s264_s12 = smov [#allocation7]  }
   0xd   :  { %106 = vmatpush.msra.mxu0 %v53_v0  ;;  %v51_v2 = vld [vmem:[%s403_s0] sm:$0xff]  ;;  %v69_v3 = vld [vmem:[%s405_s2 + $0x78] sm:$0xff]  ;;  %v68_v4 = vld [vmem:[%s405_s2 + $0x70] sm:$0xff]  ;;  %s163_s0 = sshll.u32 %s264_s12, 4  ;;  %s165_s15 = sshll.u32 %s408_s5, 4  ;;  %vm156_vm1 = vcmask 56320   ;;  %s164_s0 = int_to_ptr.vmem [resolvable:$true] %s163_s0  ;;  %s166_s15 = int_to_ptr.hbm [resolvable:$true] %s165_s15 }
   0xe   :  { %114 = vmatpush.msra.mxu1 %v69_v3  ;;  %v67_v5 = vld [vmem:[%s405_s2 + $0x68] sm:$0xff]  ;;  %v66_v6 = vld [vmem:[%s405_s2 + $0x60] sm:$0xff]  ;;  %v65_v7 = vld [vmem:[%s405_s2 + $0x58] sm:$0xff] }
   0xf   :  { %107 = vmatpush.msra.mxu0 %v52_v1  ;;  %v64_v8 = vld [vmem:[%s405_s2 + $0x50] sm:$0xff]  ;;  %v63_v9 = vld [vmem:[%s405_s2 + $0x48] sm:$0xff]  ;;  %v62_v10 = vld [vmem:[%s405_s2 + $0x40] sm:$0xff] }
  0x10   :  { %176 = vmatmul.msk.f32.vlgmr.msra.gmra.mxu0 %vm88_vm0, %v51_v2  ;;  %115 = vmatpush.msra.mxu1 %v68_v4  ;;  %v61_v11 = vld [vmem:[%s405_s2 + $0x38] sm:$0xff]  ;;  %v60_v12 = vld [vmem:[%s405_s2 + $0x30] sm:$0xff]  ;;  %v59_v13 = vld [vmem:[%s405_s2 + $0x28] sm:$0xff] }
  0x11   :  { %v58_v14 = vld [vmem:[%s405_s2 + $0x20] sm:$0xff]  ;;  %v57_v15 = vld [vmem:[%s405_s2 + $0x18] sm:$0xff]  ;;  %v56_v16 = vld [vmem:[%s405_s2 + $0x10] sm:$0xff] }
  0x12   :  { %116 = vmatpush.msra.mxu1 %v67_v5  ;;  %v55_v17 = vld [vmem:[%s405_s2 + $0x8] sm:$0xff]  ;;  %v54_v18 = vld [vmem:[%s405_s2] sm:$0xff]  ;;  %v85_v19 = vld [vmem:[%s406_s3 + $0x78] sm:$0xff] }
  0x13   :  { %v84_v20 = vld [vmem:[%s406_s3 + $0x70] sm:$0xff]  ;;  %136 = vmatpush.msra.mxu2 %v85_v19  ;;  %v83_v21 = vld [vmem:[%s406_s3 + $0x68] sm:$0xff]  ;;  %v82_v22 = vld [vmem:[%s406_s3 + $0x60] sm:$0xff] }
  0x14   :  { %117 = vmatpush.msra.mxu1 %v66_v6  ;;  %v81_v23 = vld [vmem:[%s406_s3 + $0x58] sm:$0xff]  ;;  %v80_v24 = vld [vmem:[%s406_s3 + $0x50] sm:$0xff]  ;;  %v79_v25 = vld [vmem:[%s406_s3 + $0x48] sm:$0xff] }
  0x15   :  { %137 = vmatpush.msra.mxu2 %v84_v20  ;;  %v78_v26 = vld [vmem:[%s406_s3 + $0x40] sm:$0xff]  ;;  %v77_v27 = vld [vmem:[%s406_s3 + $0x38] sm:$0xff]  ;;  %v76_v28 = vld [vmem:[%s406_s3 + $0x30] sm:$0xff] }
  0x16   :  { %118 = vmatpush.msra.mxu1 %v65_v7  ;;  %v75_v29 = vld [vmem:[%s406_s3 + $0x28] sm:$0xff]  ;;  %v74_v30 = vld [vmem:[%s406_s3 + $0x20] sm:$0xff]  ;;  %v86_v31 = vld [vmem:[#allocation5] sm:$0x7] }
  0x17   :  { %138 = vmatpush.msra.mxu2 %v83_v21  ;;  %v73_v32 = vld [vmem:[%s406_s3 + $0x18] sm:$0xff]  ;;  %v87_v33 = vperm.slane %v86_v31, 0  ;;  %v72_v37 = vld [vmem:[%s406_s3 + $0x10] sm:$0xff]  ;;  %v71_v38 = vld [vmem:[%s406_s3 + $0x8] sm:$0xff]  ;;  %v113_v40 = vperm.slane %v86_v31, 1  ;;  %v135_v44 = vperm.slane %v86_v31, 2 }
  0x18   :  { %119 = vmatpush.msra.mxu1 %v64_v8  ;;  %v70_v39 = vld [vmem:[%s406_s3] sm:$0xff] }
  0x19   :  { %139 = vmatpush.msra.mxu2 %v82_v22 }
  0x1a   :  { %120 = vmatpush.msra.mxu1 %v63_v9 }
  0x1b   :  { %140 = vmatpush.msra.mxu2 %v81_v23 }
  0x1c   :  { %121 = vmatpush.msra.mxu1 %v62_v10 }
  0x1d   :  { %141 = vmatpush.msra.mxu2 %v80_v24 }
  0x1e   :  { %122 = vmatpush.msra.mxu1 %v61_v11 }
  0x1f   :  { %142 = vmatpush.msra.mxu2 %v79_v25 }
  0x20   :  { %123 = vmatpush.msra.mxu1 %v60_v12 }
  0x21   :  { %143 = vmatpush.msra.mxu2 %v78_v26 }
  0x22   :  { %124 = vmatpush.msra.mxu1 %v59_v13 }
  0x23   :  { %144 = vmatpush.msra.mxu2 %v77_v27 }
  0x24   :  { %125 = vmatpush.msra.mxu1 %v58_v14 }
  0x25   :  { %145 = vmatpush.msra.mxu2 %v76_v28 }
  0x26   :  { %126 = vmatpush.msra.mxu1 %v57_v15 }
  0x27   :  { %146 = vmatpush.msra.mxu2 %v75_v29 }
  0x28   :  { %127 = vmatpush.msra.mxu1 %v56_v16 }
  0x29   :  { %147 = vmatpush.msra.mxu2 %v74_v30 }
  0x2a   :  { %128 = vmatpush.msra.mxu1 %v55_v17 }
  0x2b   :  { %148 = vmatpush.msra.mxu2 %v73_v32 }
  0x2c   :  { %129 = vmatpush.msra.mxu1 %v54_v18 }
  0x2d   :  { %149 = vmatpush.msra.mxu2 %v72_v37 }
  0x2f   :  { %150 = vmatpush.msra.mxu2 %v71_v38 }
  0x31   :  { %151 = vmatpush.msra.mxu2 %v70_v39 }
  0x8d   :  { %v109_v34 = vpop.f32.mrf.mxu0 }
  0x8e   :  { %v110_v35 = vadd.f32 %v109_v34, %v87_v33 }
  0x90   :  { %v112_v36 = vmax.f32 %v110_v35, 0.0 }
  0x92   :  { %130 = vmatmul.f32.vlgmr.msra.gmra.mxu1 %v112_v36 }
 0x10f   :  { %v131_v41 = vpop.f32.mrf.mxu1 }
 0x110   :  { %v132_v42 = vadd.f32 %v131_v41, %v113_v40 }
 0x112   :  { %v134_v43 = vmax.f32 %v132_v42, 0.0 }
 0x114   :  { %152 = vmatmul.f32.vlgmr.msra.gmra.mxu2 %v134_v43 }
 0x197   :  { %v153_v45 = vpop.f32.mrf.mxu2 }
 0x198   :  { %v154_v46 = vadd.f32 %v153_v45, %v135_v44 }
 0x19a   :  { %157 = vst.msk [vmem:[#allocation7] sm:$0xff] %vm156_vm1, %v154_v46 }
 0x19b   :  { %168 = dma.vmem_to_hbm [thread:$0]  %s164_s0, 128, %s166_s15, [#allocation4]  }
 0x19c   :  { %258 = dma.done.wait [#allocation4], 128  }
 0x19d   :  { %259 = vsyncadd [#allocation4], 4294967168 }
 0x19e   :  { %173 = vsyncpa [#allocation3], 1 }
 0x19f   :  { %174 = vsyncpa [#allocation6], 1 }
 0x1a0   :  { %175 = vsyncpa [#allocation4], 1 }

</bundles_post_ra>
